<compile_context>
chip_gen: v6e
topology: v6e:2x2x1
jax: 0.10.0
libtpu: 0.0.40
codegen_flags: <defaults>
</compile_context>

<pallas_src>
import functools

import jax
import jax.numpy as jnp
from jax.experimental import pallas as pl
from jax.experimental.pallas import tpu as pltpu


def _round_up(x, m):
    return ((x + m - 1) // m) * m


# ----------------------------------------------------------------------------
# Pallas kernel: fused MLP forward (+ BLM linear term), one batch tile per step
# ----------------------------------------------------------------------------
def _bnn_kernel(n_hidden, dim_hidden, compact, out_w, *refs):
    """refs = x, x_linear, w1, [wh_packed], wo, b_packed, beta, out."""
    it = iter(refs)
    x_ref = next(it)                                  # (TB, dim_in)       bf16
    xlin_ref = next(it)                               # (TB, lin_in)       f32
    w1_ref = next(it)                                 # (dim_in, dh)       bf16
    wh_ref = next(it) if n_hidden > 0 else None       # (n_hidden, dh, dh) bf16
    wo_ref = next(it)                                 # compact: (1, dh) f32
    b_ref = next(it)                                  # (n_hidden+2, Wmax) f32
    beta_ref = next(it)                               # compact: (1, lin_in) f32
    out_ref = next(it)                                # (TB, out_w)        f32

    biases = b_ref[...]                               # load once; static slices

    # fc1 + relu : bf16 MXU operands, f32 accumulate, f32 elementwise
    h = jnp.dot(x_ref[...], w1_ref[...], preferred_element_type=jnp.float32)
    h = jnp.maximum(h + biases[0:1, :dim_hidden], 0.0)

    # hidden HSLayers + relu (packed weights, static per-layer slice)
    for li in range(n_hidden):
        h = jnp.dot(h.astype(jnp.bfloat16), wh_ref[li],
                    preferred_element_type=jnp.float32)
        h = jnp.maximum(h + biases[li + 1:li + 2, :dim_hidden], 0.0)

    if compact:
        # fc_out (dim_out == 1): VPU multiply + cross-lane reduce -> (TB, 1).
        y = jnp.sum(h * wo_ref[...], axis=-1, keepdims=True)
        y = y + biases[n_hidden + 1:n_hidden + 2, 0:1]
        # BLM linear term, f32 on the VPU: ypred_bnn + x_linear @ beta^T
        y = y + jnp.sum(xlin_ref[...] * beta_ref[...], axis=-1, keepdims=True)
    else:
        # General dim_out: lane-dense padded slab via the MXU.
        y = jnp.dot(h.astype(jnp.bfloat16), wo_ref[...],
                    preferred_element_type=jnp.float32)
        y = y + biases[n_hidden + 1:n_hidden + 2, :out_w]
        if xlin_ref.shape[1] == 1:
            y = y + xlin_ref[...] * beta_ref[...]
        else:
            y = y + jnp.dot(xlin_ref[...], beta_ref[...],
                            preferred_element_type=jnp.float32)

    out_ref[...] = y.astype(out_ref.dtype)


def bnn_forward(x, packed, x_linear, dim_out, *, block_b=1024):
    """Run the fused BNN forward Pallas kernel on packed sampled parameters."""
    w1 = packed["w1"]
    wh = packed["wh"]
    wo = packed["wo"]
    b_packed = packed["b"]
    beta = packed["beta"]
    compact = packed["compact"]

    n_hidden = 0 if wh is None else wh.shape[0]
    batch, dim_in = x.shape
    dim_hidden = w1.shape[1]
    lin_in = x_linear.shape[1]
    out_w = 1 if compact else wo.shape[1]

    # Batch tile selection:
    #   * single big step when the padded batch fits in `block_b` rows
    #     (v5e / v6e: 1 TensorCore -> extra grid steps are pure overhead),
    #   * otherwise `block_b`-row tiles on a "parallel" axis.
    # On v7x (2 TCs) you may prefer an even >=2 step count so both cores get
    # work; tune `block_b` accordingly (VMEM is nowhere near a constraint).
    pb8 = _round_up(batch, 8)
    tb = pb8 if pb8 <= block_b else _round_up(block_b, 8)
    pb = _round_up(batch, tb)
    if pb != batch:
        x = jnp.pad(x, ((0, pb - batch), (0, 0)))
        x_linear = jnp.pad(x_linear, ((0, pb - batch), (0, 0)))
    x = x.astype(jnp.bfloat16)   # halve per-step x DMA bytes; MXU-native

    grid = (pb // tb,)

    def _resident(arr):
        nd = arr.ndim
        return pl.BlockSpec(arr.shape, lambda i, _nd=nd: (0,) * _nd)

    in_specs = [
        pl.BlockSpec((tb, dim_in), lambda i: (i, 0)),
        pl.BlockSpec((tb, lin_in), lambda i: (i, 0)),
        _resident(w1),
    ]
    args = [x, x_linear, w1]
    if n_hidden > 0:
        in_specs.append(_resident(wh))
        args.append(wh)
    in_specs += [_resident(wo), _resident(b_packed), _resident(beta)]
    args += [wo, b_packed, beta]

    out_spec = pl.BlockSpec((tb, out_w), lambda i: (i, 0))

    kernel = functools.partial(_bnn_kernel, n_hidden, dim_hidden, compact, out_w)

    y = pl.pallas_call(
        kernel,
        out_shape=jax.ShapeDtypeStruct((pb, out_w), jnp.float32),
        grid=grid,
        in_specs=in_specs,
        out_specs=out_spec,
        compiler_params=pltpu.CompilerParams(
            dimension_semantics=("parallel",),
        ),
    )(*args)

    if compact:
        return y[:batch]                 # (batch, 1) == (batch, dim_out)
    return y[:batch, :dim_out]


# ----------------------------------------------------------------------------
# Parameter construction + sampling (plain JAX glue)
# ----------------------------------------------------------------------------
def init_bnn_params(key, dim_in, dim_out, dim_hidden, n_layers, linear_dim_in):
    """Deterministic variational parameters for each HS layer and the BLM."""
    def layer_params(k, fan_in, fan_out):
        k1, k2, k3, k4 = jax.random.split(k, 4)
        scale = 1.0 / jnp.sqrt(jnp.float32(fan_in))
        return dict(
            w_mu=jax.random.normal(k1, (fan_in, fan_out), jnp.float32) * scale,
            w_logsig2=-9.0 + 0.01 * jax.random.normal(k2, (fan_in, fan_out), jnp.float32),
            b_mu=jnp.zeros((1, fan_out), jnp.float32),
            b_logsig2=-9.0 + 0.01 * jax.random.normal(k3, (1, fan_out), jnp.float32),
            lam_mu=jnp.zeros((1, fan_out), jnp.float32),
            lam_logsig2=-9.0 + 0.01 * jax.random.normal(k4, (1, fan_out), jnp.float32),
        )

    keys = jax.random.split(key, n_layers + 2)
    return dict(
        fc1=layer_params(keys[0], dim_in, dim_hidden),
        fc_hidden=[layer_params(keys[1 + i], dim_hidden, dim_hidden)
                   for i in range(n_layers - 1)],
        fc_out=layer_params(keys[n_layers], dim_hidden, dim_out),
        # BLM buffers: beta_mu = 2.0 init, beta_sig2 = exp(Normal(-9, 0.01))
        blm_beta_mu=jnp.full((dim_out, linear_dim_in), 2.0, jnp.float32),
        blm_beta_sig2=jnp.exp(-9.0 + 0.01 * jax.random.normal(
            keys[n_layers + 1], (dim_out, linear_dim_in), jnp.float32)),
    )


def pack_sampled_weights(key, params, dim_out, sample=True):
    """Materialize sampled weights once per forward, in kernel-friendly layout."""
    def sample_layer(k, p):
        kw, kb, kl = jax.random.split(k, 3)
        if sample:
            w = p["w_mu"] + jnp.sqrt(jnp.exp(p["w_logsig2"])) * jax.random.normal(
                kw, p["w_mu"].shape, jnp.float32)
            b = p["b_mu"] + jnp.sqrt(jnp.exp(p["b_logsig2"])) * jax.random.normal(
                kb, p["b_mu"].shape, jnp.float32)
            lam = p["lam_mu"] + jnp.sqrt(jnp.exp(p["lam_logsig2"])) * jax.random.normal(
                kl, p["lam_mu"].shape, jnp.float32)
        else:
            w, b, lam = p["w_mu"], p["b_mu"], p["lam_mu"]
        s = jnp.exp(0.5 * lam)          # per-output-unit horseshoe-like scale
        return w * s, b * s

    n_hidden = len(params["fc_hidden"])
    keys = jax.random.split(key, n_hidden + 3)

    w1, b1 = sample_layer(keys[0], params["fc1"])
    hidden = [sample_layer(keys[1 + i], params["fc_hidden"][i])
              for i in range(n_hidden)]
    wo, bo = sample_layer(keys[1 + n_hidden], params["fc_out"])

    if sample:
        beta = params["blm_beta_mu"] + jnp.sqrt(params["blm_beta_sig2"]) * \
            jax.random.normal(keys[2 + n_hidden], params["blm_beta_mu"].shape,
                              jnp.float32)
    else:
        beta = params["blm_beta_mu"]

    dim_hidden = w1.shape[1]
    compact = (dim_out == 1)

    def pad_cols(a, width):
        return jnp.pad(a, ((0, 0), (0, width - a.shape[1])))

    # MXU operands in bf16 (halves weight DMA bytes); hidden weights packed
    # into ONE (n_hidden, dh, dh) resident array.
    w1_b = w1.astype(jnp.bfloat16)
    wh_b = (jnp.stack([wh.astype(jnp.bfloat16) for wh, _ in hidden], axis=0)
            if n_hidden > 0 else None)

    if compact:
        wo_arr = wo.T                                  # (1, dh) f32 VPU operand
        w_max = dim_hidden
        beta_arr = beta                                # (1, lin_in) f32
    else:
        out_pad = _round_up(max(dim_out, 128), 128)    # lane-dense padded slab
        wo_arr = pad_cols(wo, out_pad).astype(jnp.bfloat16)
        w_max = max(dim_hidden, out_pad)
        beta_arr = pad_cols(beta.T, out_pad)           # (lin_in, out_pad) f32

    # One packed f32 bias array: rows = [fc1, hidden..., fc_out].
    b_rows = [pad_cols(b1, w_max)] + [pad_cols(bh, w_max) for _, bh in hidden] \
             + [pad_cols(bo, w_max)]
    b_packed = jnp.concatenate(b_rows, axis=0)

    return dict(w1=w1_b, wh=wh_b, wo=wo_arr, b=b_packed, beta=beta_arr,
                compact=compact)


# ----------------------------------------------------------------------------
# Pure-JAX reference (mirrors the kernel's bf16-matmul / f32-accumulate math)
# ----------------------------------------------------------------------------
def bnn_forward_ref(x, packed, x_linear, dim_out):
    w1, wh, wo = packed["w1"], packed["wh"], packed["wo"]
    b, beta, compact = packed["b"], packed["beta"], packed["compact"]
    dh = w1.shape[1]
    n_hidden = 0 if wh is None else wh.shape[0]

    h = jnp.dot(x.astype(jnp.bfloat16), w1, preferred_element_type=jnp.float32)
    h = jnp.maximum(h + b[0:1, :dh], 0.0)
    for li in range(n_hidden):
        h = jnp.dot(h.astype(jnp.bfloat16), wh[li],
                    preferred_element_type=jnp.float32)
        h = jnp.maximum(h + b[li + 1:li + 2, :dh], 0.0)

    if compact:
        y = jnp.sum(h * wo, axis=-1, keepdims=True)
        y = y + b[n_hidden + 1:n_hidden + 2, 0:1]
        y = y + jnp.sum(x_linear * beta, axis=-1, keepdims=True)
        return y
    out_pad = wo.shape[1]
    y = jnp.dot(h.astype(jnp.bfloat16), wo, preferred_element_type=jnp.float32)
    y = y + b[n_hidden + 1:n_hidden + 2, :out_pad]
    if x_linear.shape[1] == 1:
        y = y + x_linear * beta
    else:
        y = y + jnp.dot(x_linear, beta, preferred_element_type=jnp.float32)
    return y[:, :dim_out]


# ----------------------------------------------------------------------------
if __name__ == "__main__":
    # Small shapes consistent with the module's forward (regression head +
    # BLM linear term): fc1(8->128), one hidden HSLayer(128->128), out(128->1).
    batch, dim_in, dim_hidden, dim_out = 256, 8, 128, 1
    n_layers = 2               # fc1 + one HSLayer in fc_hidden + fc_out
    linear_dim_in = 1          # BLM linear term

    key = jax.random.PRNGKey(0)
    k_param, k_sample, k_x, k_xl = jax.random.split(key, 4)

    params = init_bnn_params(k_param, dim_in, dim_out, dim_hidden,
                             n_layers, linear_dim_in)
    packed = pack_sampled_weights(k_sample, params, dim_out, sample=True)

    x = jax.random.normal(k_x, (batch, dim_in), jnp.float32)
    x_linear = jax.random.normal(k_xl, (batch, linear_dim_in), jnp.float32)

    y = bnn_forward(x, packed, x_linear, dim_out)
    y = jax.block_until_ready(y)

    y_ref = bnn_forward_ref(x, packed, x_linear, dim_out)
    assert y.shape == (batch, dim_out)
    max_err = float(jnp.max(jnp.abs(y - y_ref)))
    assert jnp.allclose(y, y_ref, atol=2e-3, rtol=2e-3), \
        f"mismatch vs JAX reference (max abs err {max_err})"

    print("KERNEL_OK")
</pallas_src>

<mosaic_0001>
module attributes {stable_mosaic.version = 11 : i64} {
  func.func @_bnn_kernel(%arg0: i32, %arg1: memref<256x8xbf16, #tpu.memory_space<vmem>>, %arg2: memref<256x1xf32, #tpu.memory_space<vmem>>, %arg3: memref<8x128xbf16, #tpu.memory_space<vmem>>, %arg4: memref<1x128x128xbf16, #tpu.memory_space<vmem>>, %arg5: memref<1x128xf32, #tpu.memory_space<vmem>>, %arg6: memref<3x128xf32, #tpu.memory_space<vmem>>, %arg7: memref<1x1xf32, #tpu.memory_space<vmem>>, %arg8: memref<256x1xf32, #tpu.memory_space<vmem>>) attributes {dimension_semantics = [#tpu.dimension_semantics<parallel>], iteration_bounds = array<i64: 1>, scalar_prefetch = 0 : i64, scratch_operands = 0 : i64, tpu.core_type = #tpu.core_type<tc>, window_params = [{transform_indices = @transform_0, window_bounds = array<i64: 256, 8>}, {transform_indices = @transform_1, window_bounds = array<i64: 256, 1>}, {pipeline_mode = #tpu.pipeline_mode<synchronous>, transform_indices = @transform_2, window_bounds = array<i64: 8, 128>}, {pipeline_mode = #tpu.pipeline_mode<synchronous>, transform_indices = @transform_3, window_bounds = array<i64: 1, 128, 128>}, {pipeline_mode = #tpu.pipeline_mode<synchronous>, transform_indices = @transform_4, window_bounds = array<i64: 1, 128>}, {pipeline_mode = #tpu.pipeline_mode<synchronous>, transform_indices = @transform_5, window_bounds = array<i64: 3, 128>}, {pipeline_mode = #tpu.pipeline_mode<synchronous>, transform_indices = @transform_6, window_bounds = array<i64: 1, 1>}, {transform_indices = @transform_7, window_bounds = array<i64: 256, 1>}]} {
    %c0 = arith.constant 0 : index
    %c0_0 = arith.constant 0 : index
    %0 = vector.load %arg6[%c0, %c0_0] : memref<3x128xf32, #tpu.memory_space<vmem>>, vector<3x128xf32>
    %c0_1 = arith.constant 0 : index
    %c0_2 = arith.constant 0 : index
    %1 = vector.load %arg1[%c0_1, %c0_2] : memref<256x8xbf16, #tpu.memory_space<vmem>>, vector<256x8xbf16>
    %c0_3 = arith.constant 0 : index
    %c0_4 = arith.constant 0 : index
    %2 = vector.load %arg3[%c0_3, %c0_4] : memref<8x128xbf16, #tpu.memory_space<vmem>>, vector<8x128xbf16>
    %cst = arith.constant dense<0.000000e+00> : vector<256x128xf32>
    %3 = tpu.matmul %1, %2, %cst {dimension_numbers = #tpu.dot_dimension_numbers<[1], [0], [0], [1], [0, 0, 1, 1], [], []>} : vector<256x8xbf16>, vector<8x128xbf16>, vector<256x128xf32> -> vector<256x128xf32>
    %4 = vector.extract_strided_slice %0 {offsets = [0, 0], sizes = [1, 128], strides = [1, 1]} : vector<3x128xf32> to vector<1x128xf32>
    %5 = vector.broadcast %4 : vector<1x128xf32> to vector<256x128xf32>
    %6 = arith.addf %3, %5 : vector<256x128xf32>
    %cst_5 = arith.constant 0.000000e+00 : f32
    %7 = vector.broadcast %cst_5 : f32 to vector<256x128xf32>
    %8 = arith.maximumf %6, %7 : vector<256x128xf32>
    %9 = arith.truncf %8 : vector<256x128xf32> to vector<256x128xbf16>
    %c0_6 = arith.constant 0 : index
    %c0_7 = arith.constant 0 : index
    %c0_8 = arith.constant 0 : index
    %10 = vector.load %arg4[%c0_6, %c0_7, %c0_8] : memref<1x128x128xbf16, #tpu.memory_space<vmem>>, vector<1x128x128xbf16>
    %11 = vector.shape_cast %10 : vector<1x128x128xbf16> to vector<128x128xbf16>
    %cst_9 = arith.constant dense<0.000000e+00> : vector<256x128xf32>
    %12 = tpu.matmul %9, %11, %cst_9 {dimension_numbers = #tpu.dot_dimension_numbers<[1], [0], [0], [1], [0, 0, 1, 1], [], []>} : vector<256x128xbf16>, vector<128x128xbf16>, vector<256x128xf32> -> vector<256x128xf32>
    %13 = vector.extract_strided_slice %0 {offsets = [1, 0], sizes = [1, 128], strides = [1, 1]} : vector<3x128xf32> to vector<1x128xf32>
    %14 = vector.broadcast %13 : vector<1x128xf32> to vector<256x128xf32>
    %15 = arith.addf %12, %14 : vector<256x128xf32>
    %cst_10 = arith.constant 0.000000e+00 : f32
    %16 = vector.broadcast %cst_10 : f32 to vector<256x128xf32>
    %17 = arith.maximumf %15, %16 : vector<256x128xf32>
    %c0_11 = arith.constant 0 : index
    %c0_12 = arith.constant 0 : index
    %18 = vector.load %arg5[%c0_11, %c0_12] : memref<1x128xf32, #tpu.memory_space<vmem>>, vector<1x128xf32>
    %19 = vector.broadcast %18 : vector<1x128xf32> to vector<256x128xf32>
    %20 = arith.mulf %17, %19 : vector<256x128xf32>
    %cst_13 = arith.constant dense<0.000000e+00> : vector<256xf32>
    %21 = vector.multi_reduction <add>, %20, %cst_13 [1] : vector<256x128xf32> to vector<256xf32>
    %22 = vector.shape_cast %21 : vector<256xf32> to vector<256x1xf32>
    %23 = vector.extract_strided_slice %0 {offsets = [2, 0], sizes = [1, 1], strides = [1, 1]} : vector<3x128xf32> to vector<1x1xf32>
    %24 = vector.broadcast %23 : vector<1x1xf32> to vector<256x1xf32>
    %25 = arith.addf %22, %24 : vector<256x1xf32>
    %c0_14 = arith.constant 0 : index
    %c0_15 = arith.constant 0 : index
    %26 = vector.load %arg2[%c0_14, %c0_15] : memref<256x1xf32, #tpu.memory_space<vmem>>, vector<256x1xf32>
    %c0_16 = arith.constant 0 : index
    %c0_17 = arith.constant 0 : index
    %27 = vector.load %arg7[%c0_16, %c0_17] : memref<1x1xf32, #tpu.memory_space<vmem>>, vector<1x1xf32>
    %28 = vector.broadcast %27 : vector<1x1xf32> to vector<256x1xf32>
    %29 = arith.mulf %26, %28 : vector<256x1xf32>
    %cst_18 = arith.constant dense<0.000000e+00> : vector<256xf32>
    %30 = vector.multi_reduction <add>, %29, %cst_18 [1] : vector<256x1xf32> to vector<256xf32>
    %31 = vector.shape_cast %30 : vector<256xf32> to vector<256x1xf32>
    %32 = arith.addf %25, %31 : vector<256x1xf32>
    %c0_19 = arith.constant 0 : index
    %c0_20 = arith.constant 0 : index
    %33 = vector.load %arg8[%c0_19, %c0_20] : memref<256x1xf32, #tpu.memory_space<vmem>>, vector<256x1xf32>
    tpu.vector_store %arg8[%c0_19, %c0_20], %32 {strides = array<i32>} : memref<256x1xf32, #tpu.memory_space<vmem>>, vector<256x1xf32>,
    return
  }
  func.func @transform_0(%arg0: i32) -> (i32, i32) {
    %c0_i32 = arith.constant 0 : i32
    %c0_i32_0 = arith.constant 0 : i32
    return %arg0, %c0_i32 : i32, i32
  }
  func.func @transform_1(%arg0: i32) -> (i32, i32) {
    %c0_i32 = arith.constant 0 : i32
    %c0_i32_0 = arith.constant 0 : i32
    return %arg0, %c0_i32 : i32, i32
  }
  func.func @transform_2(%arg0: i32) -> (i32, i32) {
    %c0_i32 = arith.constant 0 : i32
    %c0_i32_0 = arith.constant 0 : i32
    %c0_i32_1 = arith.constant 0 : i32
    return %c0_i32, %c0_i32_0 : i32, i32
  }
  func.func @transform_3(%arg0: i32) -> (i32, i32, i32) {
    %c0_i32 = arith.constant 0 : i32
    %c0_i32_0 = arith.constant 0 : i32
    %c0_i32_1 = arith.constant 0 : i32
    %c0_i32_2 = arith.constant 0 : i32
    return %c0_i32, %c0_i32_0, %c0_i32_1 : i32, i32, i32
  }
  func.func @transform_4(%arg0: i32) -> (i32, i32) {
    %c0_i32 = arith.constant 0 : i32
    %c0_i32_0 = arith.constant 0 : i32
    %c0_i32_1 = arith.constant 0 : i32
    return %c0_i32, %c0_i32_0 : i32, i32
  }
  func.func @transform_5(%arg0: i32) -> (i32, i32) {
    %c0_i32 = arith.constant 0 : i32
    %c0_i32_0 = arith.constant 0 : i32
    %c0_i32_1 = arith.constant 0 : i32
    return %c0_i32, %c0_i32_0 : i32, i32
  }
  func.func @transform_6(%arg0: i32) -> (i32, i32) {
    %c0_i32 = arith.constant 0 : i32
    %c0_i32_0 = arith.constant 0 : i32
    %c0_i32_1 = arith.constant 0 : i32
    return %c0_i32, %c0_i32_0 : i32, i32
  }
  func.func @transform_7(%arg0: i32) -> (i32, i32) {
    %c0_i32 = arith.constant 0 : i32
    %c0_i32_0 = arith.constant 0 : i32
    return %arg0, %c0_i32 : i32, i32
  }
}

</mosaic_0001>

<bundles_post_ra>
// kernel: tpu_custom_call.1
= control target key start
LH: loop header
LB: loop body
LE: loop exit
PB: predicated region body
PF: predicated region fallthrough
CT: control target
= control target key end

     0   :  { %vm196_vm0 = vcmask 1043456   ;;  %vm147_vm1 = vcmask 64512   ;;  %v63_v26 = vlaneseq  ;;  %vm944_vm2 = vcmask 7168   ;;  %s1731_s2 = inlined_call_operand.vmem [shape: bf16[8,128], index: 2, kind: input, shape index: {}]   ;;  %s1732_s0 = inlined_call_operand.vmem [shape: bf16[256,8], index: 0, kind: input, shape index: {}]   ;;  %s1733_s3 = inlined_call_operand.vmem [shape: bf16[1,128,128], index: 3, kind: input, shape index: {}]   ;;  %s1734_s5 = inlined_call_operand.vmem [shape: f32[3,128], index: 5, kind: input, shape index: {}]   ;;  %s1735_s6 = inlined_call_operand.<no memory space> [shape: f32[1,1], index: 6, kind: input, shape index: {}]   ;;  %s1736_s4 = inlined_call_operand.vmem [shape: f32[1,128], index: 4, kind: input, shape index: {}]   ;;  %s1737_s1 = inlined_call_operand.vmem [shape: f32[256,1], index: 1, kind: input, shape index: {}]   ;;  %s1738_s7 = inlined_call_operand.vmem [shape: f32[256,1], index: 7, kind: output, shape index: {}]  }
   0x1   :  { %v62_v0 = vld [vmem:[%s1731_s2] sm:$0xf]  ;;  %v1164_v3 = vld [vmem:[%s1732_s0 + $0x8] sm:$0xff]   ;;  %v1165_v4 = vld [vmem:[%s1732_s0 + $0x10] sm:$0xff]  }
   0x2   :  { %1162 = vmatprep.subr.msk.bf16.mxu0 %vm196_vm0, %v62_v0  ;;  %v198_v1 = vsel %vm196_vm0, %v62_v0, 0  ;;  %v1163_v2 = vld [vmem:[%s1732_s0] sm:$0xff]   ;;  %v1166_v5 = vld [vmem:[%s1732_s0 + $0x18] sm:$0xff]   ;;  %v1168_v7 = vld [vmem:[%s1732_s0 + $0x28] sm:$0xff]   ;;  %v1318_v27 = vshrl.u32 %v63_v26, 7 }
   0x3   :  { %1065 = vmatpush3.bf16.msra.mxu0 %v198_v1  ;;  %1066 = vmatprep.mubr.msk.bf16.mxu0 %vm147_vm1, %v1163_v2  ;;  %v1167_v6 = vld [vmem:[%s1732_s0 + $0x20] sm:$0xff]   ;;  %v1169_v8 = vld [vmem:[%s1732_s0 + $0x30] sm:$0xff]   ;;  %v1179_v9 = vld [vmem:[%s1733_s3 + $0x38] sm:$0xff]  }
   0x4   :  { %v1180_v10 = vld [vmem:[%s1733_s3 + $0x30] sm:$0xff]   ;;  %1098 = vmatprep.subr.bf16.mxu0 %v1179_v9  ;;  %1146 = vmatprep.subr.bf16.mxu1 %v1179_v9  ;;  %v1181_v11 = vld [vmem:[%s1733_s3 + $0x28] sm:$0xff]   ;;  %v1170_v12 = vld [vmem:[%s1732_s0 + $0x38] sm:$0xff]   ;;  %v65_v28 = vsub.s32 0, %v1318_v27 }
   0x5   :  { %1154 = vmatpush3.bf16.msra.mxu1 %v1179_v9  ;;  %v1182_v13 = vld [vmem:[%s1733_s3 + $0x20] sm:$0xff]   ;;  %v1183_v15 = vld [vmem:[%s1733_s3 + $0x18] sm:$0xff]   ;;  %v1172_v16 = vld [vmem:[%s1732_s0 + $0x48] sm:$0xff]  }
   0x6   :  { %1067 = vmatmul.mubr.msk.bf16.vlgmr.msra.gmra.mxu0 %vm147_vm1, %v1164_v3  ;;  %1147 = vmatprep.subr.bf16.mxu1 %v1180_v10  ;;  %v1171_v14 = vld [vmem:[%s1732_s0 + $0x40] sm:$0xff]   ;;  %v1184_v17 = vld [vmem:[%s1733_s3 + $0x10] sm:$0xff]   ;;  %v1174_v19 = vld [vmem:[%s1732_s0 + $0x58] sm:$0xff]  }
   0x7   :  { %1070 = vmatprep.mubr.msk.bf16.mxu0 %vm147_vm1, %v1165_v4  ;;  %1099 = vmatpush3.bf16.msra.mxu0 %v1179_v9  ;;  %v1173_v18 = vld [vmem:[%s1732_s0 + $0x50] sm:$0xff]   ;;  %v1175_v20 = vld [vmem:[%s1732_s0 + $0x60] sm:$0xff]   ;;  %v1176_v21 = vld [vmem:[%s1732_s0 + $0x68] sm:$0xff]  }
   0x8   :  { %1100 = vmatprep.subr.bf16.mxu0 %v1180_v10  ;;  %v1177_v22 = vld [vmem:[%s1732_s0 + $0x70] sm:$0xff]   ;;  %v1178_v23 = vld [vmem:[%s1732_s0 + $0x78] sm:$0xff]   ;;  %v1185_v24 = vld [vmem:[%s1733_s3 + $0x8] sm:$0xff]  }
   0x9   :  { %1155 = vmatpush3.bf16.msra.mxu1 %v1180_v10  ;;  %v1186_v25 = vld [vmem:[%s1733_s3] sm:$0xff]  }
   0xa   :  { %1148 = vmatprep.subr.bf16.mxu1 %v1181_v11  ;;  %v1324_v29 = vld [vmem:[%s1734_s5] sm:$0x7] }
   0xb   :  { %1101 = vmatpush3.bf16.msra.mxu0 %v1180_v10  ;;  %v1327_v31 = vrot.slane %v1324_v29, %v65_v28 }
   0xc   :  { %1102 = vmatprep.subr.bf16.mxu0 %v1181_v11 }
   0xd   :  { %1156 = vmatpush3.bf16.msra.mxu1 %v1181_v11 }
   0xe   :  { %1071 = vmatmul.mubr.msk.bf16.gmra.mxu0 %vm147_vm1, %v1166_v5  ;;  %1149 = vmatprep.subr.bf16.mxu1 %v1182_v13 }
   0xf   :  { %1074 = vmatprep.mubr.msk.bf16.mxu0 %vm147_vm1, %v1167_v6  ;;  %1103 = vmatpush3.bf16.msra.mxu0 %v1181_v11 }
  0x10   :  { %1104 = vmatprep.subr.bf16.mxu0 %v1182_v13 }
  0x11   :  { %1157 = vmatpush3.bf16.msra.mxu1 %v1182_v13 }
  0x12   :  { %1150 = vmatprep.subr.bf16.mxu1 %v1183_v15 }
  0x13   :  { %1105 = vmatpush3.bf16.msra.mxu0 %v1182_v13 }
  0x14   :  { %1106 = vmatprep.subr.bf16.mxu0 %v1183_v15 }
  0x15   :  { %1158 = vmatpush3.bf16.msra.mxu1 %v1183_v15 }
  0x16   :  { %1075 = vmatmul.mubr.msk.bf16.gmra.mxu0 %vm147_vm1, %v1168_v7  ;;  %1151 = vmatprep.subr.bf16.mxu1 %v1184_v17 }
  0x17   :  { %1078 = vmatprep.mubr.msk.bf16.mxu0 %vm147_vm1, %v1169_v8  ;;  %1107 = vmatpush3.bf16.msra.mxu0 %v1183_v15 }
  0x18   :  { %1108 = vmatprep.subr.bf16.mxu0 %v1184_v17 }
  0x19   :  { %1159 = vmatpush3.bf16.msra.mxu1 %v1184_v17 }
  0x1a   :  { %1152 = vmatprep.subr.bf16.mxu1 %v1185_v24 }
  0x1b   :  { %1109 = vmatpush3.bf16.msra.mxu0 %v1184_v17 }
  0x1c   :  { %1110 = vmatprep.subr.bf16.mxu0 %v1185_v24 }
  0x1d   :  { %1160 = vmatpush3.bf16.msra.mxu1 %v1185_v24 }
  0x1e   :  { %1079 = vmatmul.mubr.msk.bf16.gmra.mxu0 %vm147_vm1, %v1170_v12  ;;  %1153 = vmatprep.subr.bf16.mxu1 %v1186_v25 }
  0x1f   :  { %1082 = vmatprep.mubr.msk.bf16.mxu0 %vm147_vm1, %v1171_v14  ;;  %1111 = vmatpush3.bf16.msra.mxu0 %v1185_v24 }
  0x20   :  { %1112 = vmatprep.subr.bf16.mxu0 %v1186_v25 }
  0x21   :  { %1161 = vmatpush3.bf16.msra.mxu1 %v1186_v25 }
  0x23   :  { %1113 = vmatpush3.bf16.msra.mxu0 %v1186_v25 }
  0x26   :  { %1083 = vmatmul.mubr.msk.bf16.gmra.mxu0 %vm147_vm1, %v1172_v16 }
  0x27   :  { %1086 = vmatprep.mubr.msk.bf16.mxu0 %vm147_vm1, %v1173_v18 }
  0x2e   :  { %1087 = vmatmul.mubr.msk.bf16.gmra.mxu0 %vm147_vm1, %v1174_v19 }
  0x2f   :  { %1090 = vmatprep.mubr.msk.bf16.mxu0 %vm147_vm1, %v1175_v20 }
  0x36   :  { %1091 = vmatmul.mubr.msk.bf16.gmra.mxu0 %vm147_vm1, %v1176_v21 }
  0x37   :  { %1094 = vmatprep.mubr.msk.bf16.mxu0 %vm147_vm1, %v1177_v22 }
  0x3e   :  { %1095 = vmatmul.mubr.msk.bf16.gmra.mxu0 %vm147_vm1, %v1178_v23 }
  0xc6   :  { %v1068_v30 = vpop.f32.mrf.mxu0 }
  0xc7   :  { %v243_v36 = vadd.f32 %v1068_v30, %v1327_v31 }
  0xc8   :  { %v234_v32 = vpop.f32.mrf.mxu0 }
  0xc9   :  { %v235_v34 = vadd.f32 %v234_v32, %v1327_v31  ;;  %v363_v43 = vmax.f32 %v243_v36, 0.0 }
  0xca   :  { %v1069_v33 = vpop.f32.mrf.mxu0 }
  0xcb   :  { %v246_v35 = vadd.f32 %v1069_v33, %v1327_v31  ;;  %v361_v41 = vmax.f32 %v235_v34, 0.0 }
  0xcc   :  { %v237_v37 = vpop.f32.mrf.mxu0 }
  0xcd   :  { %v238_v38 = vadd.f32 %v237_v37, %v1327_v31  ;;  %v364_v39 = vmax.f32 %v246_v35, 0.0 }
  0xce   :  { %v1072_v40 = vpop.f32.mrf.mxu0 }
  0xcf   :  { %v362_v42 = vmax.f32 %v238_v38, 0.0  ;;  %v394_v46 = vpack.c.bf16 %v364_v39, %v363_v43  ;;  %v259_v50 = vadd.f32 %v1072_v40, %v1327_v31 }
  0xd0   :  { %v250_v44 = vpop.f32.mrf.mxu0 }
  0xd1   :  { %v393_v45 = vpack.c.bf16 %v362_v42, %v361_v41  ;;  %v251_v48 = vadd.f32 %v250_v44, %v1327_v31  ;;  %v367_v57 = vmax.f32 %v259_v50, 0.0 }
  0xd2   :  { %v1073_v47 = vpop.f32.mrf.mxu0 }
  0xd3   :  { %v262_v49 = vadd.f32 %v1073_v47, %v1327_v31  ;;  %1114 = vmatprep.mubr.bf16.mxu0 %v393_v45  ;;  %v365_v55 = vmax.f32 %v251_v48, 0.0 }
  0xd4   :  { %v253_v51 = vpop.f32.mrf.mxu0  ;;  %1115 = vmatmul.mubr.bf16.vlgmr.msra.gmra.mxu0 %v394_v46 }
  0xd5   :  { %v254_v52 = vadd.f32 %v253_v51, %v1327_v31  ;;  %v368_v53 = vmax.f32 %v262_v49, 0.0 }
  0xd6   :  { %v1076_v54 = vpop.f32.mrf.mxu0 }
  0xd7   :  { %v366_v56 = vmax.f32 %v254_v52, 0.0  ;;  %v396_v60 = vpack.c.bf16 %v368_v53, %v367_v57  ;;  %v275_v0 = vadd.f32 %v1076_v54, %v1327_v31 }
  0xd8   :  { %v266_v58 = vpop.f32.mrf.mxu0 }
  0xd9   :  { %v395_v59 = vpack.c.bf16 %v366_v56, %v365_v55  ;;  %v267_v62 = vadd.f32 %v266_v58, %v1327_v31  ;;  %v371_v7 = vmax.f32 %v275_v0, 0.0 }
  0xda   :  { %v1077_v61 = vpop.f32.mrf.mxu0 }
  0xdb   :  { %v278_v63 = vadd.f32 %v1077_v61, %v1327_v31  ;;  %1118 = vmatprep.mubr.bf16.mxu1 %v395_v59  ;;  %v369_v5 = vmax.f32 %v267_v62, 0.0 }
  0xdc   :  { %v269_v1 = vpop.f32.mrf.mxu0  ;;  %1119 = vmatmul.mubr.bf16.vlgmr.msra.gmra.mxu1 %v396_v60 }
  0xdd   :  { %v270_v2 = vadd.f32 %v269_v1, %v1327_v31  ;;  %v372_v3 = vmax.f32 %v278_v63, 0.0 }
  0xde   :  { %v1080_v4 = vpop.f32.mrf.mxu0 }
  0xdf   :  { %v370_v6 = vmax.f32 %v270_v2, 0.0  ;;  %v398_v10 = vpack.c.bf16 %v372_v3, %v371_v7  ;;  %v291_v14 = vadd.f32 %v1080_v4, %v1327_v31 }
  0xe0   :  { %v282_v8 = vpop.f32.mrf.mxu0 }
  0xe1   :  { %v397_v9 = vpack.c.bf16 %v370_v6, %v369_v5  ;;  %v283_v12 = vadd.f32 %v282_v8, %v1327_v31  ;;  %v375_v21 = vmax.f32 %v291_v14, 0.0 }
  0xe2   :  { %v1081_v11 = vpop.f32.mrf.mxu0 }
  0xe3   :  { %v294_v13 = vadd.f32 %v1081_v11, %v1327_v31  ;;  %1122 = vmatprep.mubr.bf16.mxu1 %v397_v9  ;;  %v373_v19 = vmax.f32 %v283_v12, 0.0 }
  0xe4   :  { %v285_v15 = vpop.f32.mrf.mxu0  ;;  %1123 = vmatmul.mubr.bf16.gmra.mxu1 %v398_v10 }
  0xe5   :  { %v286_v16 = vadd.f32 %v285_v15, %v1327_v31  ;;  %v376_v17 = vmax.f32 %v294_v13, 0.0 }
  0xe6   :  { %v1084_v18 = vpop.f32.mrf.mxu0 }
  0xe7   :  { %v374_v20 = vmax.f32 %v286_v16, 0.0  ;;  %v400_v24 = vpack.c.bf16 %v376_v17, %v375_v21  ;;  %v307_v30 = vadd.f32 %v1084_v18, %v1327_v31  ;;  %v12_v18 = vstv %s1735_s6 }
  0xe8   :  { %v298_v22 = vpop.f32.mrf.mxu0  ;;  %13 = vst [vmem:[#allocation2] sm:$0x1] %v12_v18 }
  0xe9   :  { %v399_v23 = vpack.c.bf16 %v374_v20, %v373_v19  ;;  %v299_v26 = vadd.f32 %v298_v22, %v1327_v31  ;;  %v379_v38 = vmax.f32 %v307_v30, 0.0  ;;  %v427_v19 = vsub.s32 1, %v1318_v27 }
  0xea   :  { %v1085_v25 = vpop.f32.mrf.mxu0 }
  0xeb   :  { %v310_v28 = vadd.f32 %v1085_v25, %v1327_v31  ;;  %1126 = vmatprep.mubr.bf16.mxu1 %v399_v23  ;;  %v377_v36 = vmax.f32 %v299_v26, 0.0  ;;  %v1366_v20 = vrot.slane %v1324_v29, %v427_v19  ;;  %v1372_v23 = vld [vmem:[%s1736_s4] ss:$0 sm:$0xff] }
  0xec   :  { %v301_v32 = vpop.f32.mrf.mxu0  ;;  %1127 = vmatmul.mubr.bf16.gmra.mxu1 %v400_v24 }
  0xed   :  { %v302_v33 = vadd.f32 %v301_v32, %v1327_v31  ;;  %v380_v34 = vmax.f32 %v310_v28, 0.0 }
  0xee   :  { %v1088_v35 = vpop.f32.mrf.mxu0 }
  0xef   :  { %v378_v37 = vmax.f32 %v302_v33, 0.0  ;;  %v402_v41 = vpack.c.bf16 %v380_v34, %v379_v38  ;;  %v323_v45 = vadd.f32 %v1088_v35, %v1327_v31 }
  0xf0   :  { %v314_v39 = vpop.f32.mrf.mxu0 }
  0xf1   :  { %v401_v40 = vpack.c.bf16 %v378_v37, %v377_v36  ;;  %v315_v43 = vadd.f32 %v314_v39, %v1327_v31  ;;  %v383_v52 = vmax.f32 %v323_v45, 0.0 }
  0xf2   :  { %v1089_v42 = vpop.f32.mrf.mxu0 }
  0xf3   :  { %v326_v44 = vadd.f32 %v1089_v42, %v1327_v31  ;;  %1130 = vmatprep.mubr.bf16.mxu1 %v401_v40  ;;  %v381_v50 = vmax.f32 %v315_v43, 0.0 }
  0xf4   :  { %v317_v46 = vpop.f32.mrf.mxu0  ;;  %1131 = vmatmul.mubr.bf16.gmra.mxu1 %v402_v41 }
  0xf5   :  { %v318_v47 = vadd.f32 %v317_v46, %v1327_v31  ;;  %v384_v48 = vmax.f32 %v326_v44, 0.0 }
  0xf6   :  { %v1092_v49 = vpop.f32.mrf.mxu0 }
  0xf7   :  { %v382_v51 = vmax.f32 %v318_v47, 0.0  ;;  %v404_v55 = vpack.c.bf16 %v384_v48, %v383_v52  ;;  %v339_v59 = vadd.f32 %v1092_v49, %v1327_v31 }
  0xf8   :  { %v330_v53 = vpop.f32.mrf.mxu0 }
  0xf9   :  { %v403_v54 = vpack.c.bf16 %v382_v51, %v381_v50  ;;  %v331_v57 = vadd.f32 %v330_v53, %v1327_v31  ;;  %v387_v2 = vmax.f32 %v339_v59, 0.0 }
  0xfa   :  { %v1093_v56 = vpop.f32.mrf.mxu0 }
  0xfb   :  { %v342_v58 = vadd.f32 %v1093_v56, %v1327_v31  ;;  %1134 = vmatprep.mubr.bf16.mxu1 %v403_v54  ;;  %v385_v0 = vmax.f32 %v331_v57, 0.0 }
  0xfc   :  { %v333_v60 = vpop.f32.mrf.mxu0  ;;  %1135 = vmatmul.mubr.bf16.gmra.mxu1 %v404_v55 }
  0xfd   :  { %v334_v61 = vadd.f32 %v333_v60, %v1327_v31  ;;  %v388_v62 = vmax.f32 %v342_v58, 0.0 }
  0xfe   :  { %v1096_v63 = vpop.f32.mrf.mxu0 }
  0xff   :  { %v386_v1 = vmax.f32 %v334_v61, 0.0  ;;  %v406_v5 = vpack.c.bf16 %v388_v62, %v387_v2  ;;  %v355_v9 = vadd.f32 %v1096_v63, %v1327_v31 }
 0x100   :  { %v346_v3 = vpop.f32.mrf.mxu0 }
 0x101   :  { %v405_v4 = vpack.c.bf16 %v386_v1, %v385_v0  ;;  %v347_v7 = vadd.f32 %v346_v3, %v1327_v31  ;;  %v391_v15 = vmax.f32 %v355_v9, 0.0 }
 0x102   :  { %v1097_v6 = vpop.f32.mrf.mxu0 }
 0x103   :  { %v358_v8 = vadd.f32 %v1097_v6, %v1327_v31  ;;  %1138 = vmatprep.mubr.bf16.mxu1 %v405_v4  ;;  %v389_v13 = vmax.f32 %v347_v7, 0.0 }
 0x104   :  { %v349_v10 = vpop.f32.mrf.mxu0  ;;  %1139 = vmatmul.mubr.bf16.gmra.mxu1 %v406_v5 }
 0x105   :  { %v350_v11 = vadd.f32 %v349_v10, %v1327_v31  ;;  %v392_v12 = vmax.f32 %v358_v8, 0.0 }
 0x107   :  { %v390_v14 = vmax.f32 %v350_v11, 0.0  ;;  %v408_v17 = vpack.c.bf16 %v392_v12, %v391_v15 }
 0x109   :  { %v407_v16 = vpack.c.bf16 %v390_v14, %v389_v13 }
 0x10b   :  { %1142 = vmatprep.mubr.bf16.mxu1 %v407_v16 }
 0x10c   :  { %1143 = vmatmul.mubr.bf16.gmra.mxu1 %v408_v17 }
 0x194   :  { %v1116_v21 = vpop.f32.mrf.mxu0 }
 0x195   :  { %v520_v31 = vadd.f32 %v1116_v21, %v1366_v20 }
 0x196   :  { %v511_v22 = vpop.f32.mrf.mxu0 }
 0x197   :  { %v640_v24 = vmax.f32 %v520_v31, 0.0  ;;  %v512_v25 = vadd.f32 %v511_v22, %v1366_v20 }
 0x198   :  { %v1117_v26 = vpop.f32.mrf.mxu0 }
 0x199   :  { %v638_v28 = vmax.f32 %v512_v25, 0.0  ;;  %v523_v30 = vadd.f32 %v1117_v26, %v1366_v20  ;;  %v679_v32 = vmul.f32 %v1372_v23, %v640_v24 }
 0x19a   :  { %v514_v33 = vpop.f32.mrf.mxu0 }
 0x19b   :  { %v641_v34 = vmax.f32 %v523_v30, 0.0  ;;  %v515_v35 = vadd.f32 %v514_v33, %v1366_v20  ;;  %713 = vadd.xlane.f32.xlu1 %v679_v32  ;;  %v677_v36 = vmul.f32 %v1372_v23, %v638_v28 }
 0x19c   :  { %v1120_v37 = vpop.f32.mrf.mxu1 }
 0x19d   :  { %v639_v38 = vmax.f32 %v515_v35, 0.0  ;;  %v536_v39 = vadd.f32 %v1120_v37, %v1366_v20  ;;  %709 = vadd.xlane.f32.xlu0 %v677_v36  ;;  %v680_v40 = vmul.f32 %v1372_v23, %v641_v34 }
 0x19e   :  { %v527_v41 = vpop.f32.mrf.mxu1 }
 0x19f   :  { %v644_v42 = vmax.f32 %v536_v39, 0.0  ;;  %v528_v43 = vadd.f32 %v527_v41, %v1366_v20  ;;  %715 = vadd.xlane.f32.xlu1 %v680_v40  ;;  %v678_v44 = vmul.f32 %v1372_v23, %v639_v38 }
 0x1a0   :  { %v1121_v45 = vpop.f32.mrf.mxu1 }
 0x1a1   :  { %v539_v46 = vadd.f32 %v1121_v45, %v1366_v20  ;;  %711 = vadd.xlane.f32.xlu0 %v678_v44  ;;  %v642_v48 = vmax.f32 %v528_v43, 0.0  ;;  %v683_v51 = vmul.f32 %v1372_v23, %v644_v42 }
 0x1a2   :  { %v530_v47 = vpop.f32.mrf.mxu1 }
 0x1a3   :  { %v645_v49 = vmax.f32 %v539_v46, 0.0  ;;  %v531_v50 = vadd.f32 %v530_v47, %v1366_v20  ;;  %v681_v59 = vmul.f32 %v1372_v23, %v642_v48 }
 0x1a4   :  { %v1124_v52 = vpop.f32.mrf.mxu1 }
 0x1a5   :  { %v643_v53 = vmax.f32 %v531_v50, 0.0  ;;  %v552_v54 = vadd.f32 %v1124_v52, %v1366_v20  ;;  %721 = vadd.xlane.f32.xlu0 %v683_v51  ;;  %v684_v55 = vmul.f32 %v1372_v23, %v645_v49 }
 0x1a6   :  { %v543_v56 = vpop.f32.mrf.mxu1 }
 0x1a7   :  { %v648_v57 = vmax.f32 %v552_v54, 0.0  ;;  %v544_v58 = vadd.f32 %v543_v56, %v1366_v20  ;;  %723 = vadd.xlane.f32.xlu1 %v684_v55  ;;  %v682_v62 = vmul.f32 %v1372_v23, %v643_v53 }
 0x1a8   :  { %v1125_v60 = vpop.f32.mrf.mxu1 }
 0x1a9   :  { %v555_v61 = vadd.f32 %v1125_v60, %v1366_v20  ;;  %717 = vadd.xlane.f32.xlu0 %v681_v59  ;;  %v646_v0 = vmax.f32 %v544_v58, 0.0  ;;  %v687_v3 = vmul.f32 %v1372_v23, %v648_v57 }
 0x1aa   :  { %v546_v63 = vpop.f32.mrf.mxu1 }
 0x1ab   :  { %v649_v1 = vmax.f32 %v555_v61, 0.0  ;;  %v547_v2 = vadd.f32 %v546_v63, %v1366_v20  ;;  %719 = vadd.xlane.f32.xlu1 %v682_v62  ;;  %v685_v11 = vmul.f32 %v1372_v23, %v646_v0 }
 0x1ac   :  { %v1128_v4 = vpop.f32.mrf.mxu1 }
 0x1ad   :  { %v647_v5 = vmax.f32 %v547_v2, 0.0  ;;  %v568_v6 = vadd.f32 %v1128_v4, %v1366_v20  ;;  %729 = vadd.xlane.f32.xlu0 %v687_v3  ;;  %v688_v7 = vmul.f32 %v1372_v23, %v649_v1 }
 0x1ae   :  { %v559_v8 = vpop.f32.mrf.mxu1 }
 0x1af   :  { %v652_v9 = vmax.f32 %v568_v6, 0.0  ;;  %v560_v10 = vadd.f32 %v559_v8, %v1366_v20  ;;  %731 = vadd.xlane.f32.xlu1 %v688_v7  ;;  %v686_v14 = vmul.f32 %v1372_v23, %v647_v5 }
 0x1b0   :  { %v1129_v12 = vpop.f32.mrf.mxu1 }
 0x1b1   :  { %v571_v13 = vadd.f32 %v1129_v12, %v1366_v20  ;;  %725 = vadd.xlane.f32.xlu0 %v685_v11  ;;  %v650_v16 = vmax.f32 %v560_v10, 0.0  ;;  %v691_v19 = vmul.f32 %v1372_v23, %v652_v9 }
 0x1b2   :  { %v562_v15 = vpop.f32.mrf.mxu1 }
 0x1b3   :  { %v653_v17 = vmax.f32 %v571_v13, 0.0  ;;  %v563_v18 = vadd.f32 %v562_v15, %v1366_v20  ;;  %727 = vadd.xlane.f32.xlu1 %v686_v14  ;;  %v689_v30 = vmul.f32 %v1372_v23, %v650_v16 }
 0x1b4   :  { %v1132_v21 = vpop.f32.mrf.mxu1 }
 0x1b5   :  { %v651_v31 = vmax.f32 %v563_v18, 0.0  ;;  %v584_v22 = vadd.f32 %v1132_v21, %v1366_v20  ;;  %737 = vadd.xlane.f32.xlu0 %v691_v19  ;;  %v692_v24 = vmul.f32 %v1372_v23, %v653_v17 }
 0x1b6   :  { %v575_v25 = vpop.f32.mrf.mxu1 }
 0x1b7   :  { %v656_v26 = vmax.f32 %v584_v22, 0.0  ;;  %v576_v28 = vadd.f32 %v575_v25, %v1366_v20  ;;  %739 = vadd.xlane.f32.xlu1 %v692_v24  ;;  %v690_v34 = vmul.f32 %v1372_v23, %v651_v31 }
 0x1b8   :  { %v1133_v32 = vpop.f32.mrf.mxu1 }
 0x1b9   :  { %v587_v33 = vadd.f32 %v1133_v32, %v1366_v20  ;;  %733 = vadd.xlane.f32.xlu0 %v689_v30  ;;  %v654_v36 = vmax.f32 %v576_v28, 0.0  ;;  %v695_v39 = vmul.f32 %v1372_v23, %v656_v26  ;;  %v775_v32 = vsub.s32 2, %v1318_v27  ;;  %v812_v27 = vld [vmem:[%s1737_s1 + $0x18] sm:$0xff] }
 0x1ba   :  { %v578_v35 = vpop.f32.mrf.mxu1 }
 0x1bb   :  { %v657_v37 = vmax.f32 %v587_v33, 0.0  ;;  %v579_v38 = vadd.f32 %v578_v35, %v1366_v20  ;;  %735 = vadd.xlane.f32.xlu1 %v690_v34  ;;  %v693_v47 = vmul.f32 %v1372_v23, %v654_v36  ;;  %v1441_v33 = vld [vmem:[#allocation2] ss:$0 sm:$0xff]  ;;  %v1444_v34 = vrot.slane %v1324_v29, %v775_v32  ;;  %v810_v29 = vld [vmem:[%s1737_s1 + $0x8] sm:$0xff] }
 0x1bc   :  { %v1136_v40 = vpop.f32.mrf.mxu1  ;;  %v809_v35 = vld [vmem:[%s1737_s1] sm:$0xff] }
 0x1bd   :  { %v655_v41 = vmax.f32 %v579_v38, 0.0  ;;  %v600_v42 = vadd.f32 %v1136_v40, %v1366_v20  ;;  %745 = vadd.xlane.f32.xlu0 %v695_v39  ;;  %v696_v43 = vmul.f32 %v1372_v23, %v657_v37  ;;  %v848_v38 = vmul.f32 %v1441_v33, %v809_v35  ;;  %v821_v35 = vld [vmem:[%s1737_s1 + $0x60] sm:$0xff] }
 0x1be   :  { %v591_v44 = vpop.f32.mrf.mxu1 }
 0x1bf   :  { %v660_v45 = vmax.f32 %v600_v42, 0.0  ;;  %v592_v46 = vadd.f32 %v591_v44, %v1366_v20  ;;  %747 = vadd.xlane.f32.xlu1 %v696_v43  ;;  %v694_v50 = vmul.f32 %v1372_v23, %v655_v41  ;;  %v851_v42 = vmul.f32 %v1441_v33, %v812_v27 }
 0x1c0   :  { %v1137_v48 = vpop.f32.mrf.mxu1 }
 0x1c1   :  { %v603_v49 = vadd.f32 %v1137_v48, %v1366_v20  ;;  %741 = vadd.xlane.f32.xlu0 %v693_v47  ;;  %v658_v52 = vmax.f32 %v592_v46, 0.0  ;;  %v699_v55 = vmul.f32 %v1372_v23, %v660_v45  ;;  %v849_v46 = vmul.f32 %v1441_v33, %v810_v29  ;;  %v815_v48 = vld [vmem:[%s1737_s1 + $0x30] sm:$0xff] }
 0x1c2   :  { %v594_v51 = vpop.f32.mrf.mxu1 }
 0x1c3   :  { %v661_v53 = vmax.f32 %v603_v49, 0.0  ;;  %v595_v54 = vadd.f32 %v594_v51, %v1366_v20  ;;  %743 = vadd.xlane.f32.xlu1 %v694_v50  ;;  %v697_v63 = vmul.f32 %v1372_v23, %v658_v52  ;;  %v816_v51 = vld [vmem:[%s1737_s1 + $0x38] sm:$0xff] }
 0x1c4   :  { %v1140_v56 = vpop.f32.mrf.mxu1 }
 0x1c5   :  { %v659_v57 = vmax.f32 %v595_v54, 0.0  ;;  %v616_v58 = vadd.f32 %v1140_v56, %v1366_v20  ;;  %753 = vadd.xlane.f32.xlu0 %v699_v55  ;;  %v700_v59 = vmul.f32 %v1372_v23, %v661_v53  ;;  %v854_v53 = vmul.f32 %v1441_v33, %v815_v48  ;;  %v813_v55 = vld [vmem:[%s1737_s1 + $0x20] sm:$0xff] }
 0x1c6   :  { %v607_v60 = vpop.f32.mrf.mxu1 }
 0x1c7   :  { %v664_v61 = vmax.f32 %v616_v58, 0.0  ;;  %v608_v62 = vadd.f32 %v607_v60, %v1366_v20  ;;  %755 = vadd.xlane.f32.xlu1 %v700_v59  ;;  %v698_v2 = vmul.f32 %v1372_v23, %v659_v57  ;;  %v855_v57 = vmul.f32 %v1441_v33, %v816_v51  ;;  %v814_v59 = vld [vmem:[%s1737_s1 + $0x28] sm:$0xff] }
 0x1c8   :  { %v1141_v0 = vpop.f32.mrf.mxu1 }
 0x1c9   :  { %v619_v1 = vadd.f32 %v1141_v0, %v1366_v20  ;;  %749 = vadd.xlane.f32.xlu0 %v697_v63  ;;  %v662_v4 = vmax.f32 %v608_v62, 0.0  ;;  %v703_v7 = vmul.f32 %v1372_v23, %v664_v61  ;;  %v852_v62 = vmul.f32 %v1441_v33, %v813_v55  ;;  %v819_v0 = vld [vmem:[%s1737_s1 + $0x50] sm:$0xff] }
 0x1ca   :  { %v610_v3 = vpop.f32.mrf.mxu1 }
 0x1cb   :  { %v665_v5 = vmax.f32 %v619_v1, 0.0  ;;  %v611_v6 = vadd.f32 %v610_v3, %v1366_v20  ;;  %751 = vadd.xlane.f32.xlu1 %v698_v2  ;;  %v701_v14 = vmul.f32 %v1372_v23, %v662_v4  ;;  %v853_v3 = vmul.f32 %v1441_v33, %v814_v59 }
 0x1cc   :  { %v1144_v8 = vpop.f32.mrf.mxu1 }
 0x1cd   :  { %v663_v9 = vmax.f32 %v611_v6, 0.0  ;;  %761 = vadd.xlane.f32.xlu0 %v703_v7  ;;  %v704_v10 = vmul.f32 %v1372_v23, %v665_v5  ;;  %v632_v12 = vadd.f32 %v1144_v8, %v1366_v20  ;;  %v820_v5 = vld [vmem:[%s1737_s1 + $0x58] sm:$0xff]  ;;  %v858_v8 = vmul.f32 %v1441_v33, %v819_v0 }
 0x1ce   :  { %v623_v11 = vpop.f32.mrf.mxu1 }
 0x1cf   :  { %v624_v13 = vadd.f32 %v623_v11, %v1366_v20  ;;  %763 = vadd.xlane.f32.xlu1 %v704_v10  ;;  %v702_v18 = vmul.f32 %v1372_v23, %v663_v9  ;;  %v668_v21 = vmax.f32 %v632_v12, 0.0  ;;  %v817_v10 = vld [vmem:[%s1737_s1 + $0x40] sm:$0xff] }
 0x1d0   :  { %v1145_v15 = vpop.f32.mrf.mxu1 }
 0x1d1   :  { %v666_v16 = vmax.f32 %v624_v13, 0.0  ;;  %v635_v17 = vadd.f32 %v1145_v15, %v1366_v20  ;;  %757 = vadd.xlane.f32.xlu0 %v701_v14  ;;  %v707_v30 = vmul.f32 %v1372_v23, %v668_v21  ;;  %v859_v13 = vmul.f32 %v1441_v33, %v820_v5  ;;  %v818_v15 = vld [vmem:[%s1737_s1 + $0x48] sm:$0xff]  ;;  %v823_v21 = vld [vmem:[%s1737_s1 + $0x70] sm:$0xff] }
 0x1d2   :  { %v626_v19 = vpop.f32.mrf.mxu1  ;;  %v862_v32 = vmul.f32 %v1441_v33, %v823_v21 }
 0x1d3   :  { %v669_v31 = vmax.f32 %v635_v17, 0.0  ;;  %v627_v22 = vadd.f32 %v626_v19, %v1366_v20  ;;  %759 = vadd.xlane.f32.xlu1 %v702_v18  ;;  %v705_v24 = vmul.f32 %v1372_v23, %v666_v16  ;;  %v811_v20 = vld [vmem:[%s1737_s1 + $0x10] sm:$0xff]  ;;  %v856_v18 = vmul.f32 %v1441_v33, %v817_v10 }
 0x1d5   :  { %v667_v25 = vmax.f32 %v627_v22, 0.0  ;;  %765 = vadd.xlane.f32.xlu0 %v705_v24  ;;  %v708_v26 = vmul.f32 %v1372_v23, %v669_v31  ;;  %v857_v24 = vmul.f32 %v1441_v33, %v818_v15 }
 0x1d7   :  { %v706_v28 = vmul.f32 %v1372_v23, %v667_v25  ;;  %v850_v23 = vmul.f32 %v1441_v33, %v811_v20 }
 0x1d9   :  { %767 = vadd.xlane.f32.xlu1 %v706_v28  ;;  %769 = vadd.xlane.f32.xlu0 %v707_v30 }
 0x1dd   :  { %771 = vadd.xlane.f32.xlu1 %v708_v26  ;;  %v824_v26 = vld [vmem:[%s1737_s1 + $0x78] sm:$0xff] }
 0x1de   :  { %v863_v27 = vmul.f32 %v1441_v33, %v824_v26 }
 0x224   :  { %v714_v36 = vpop.xlane.xlu1 %713 }
 0x225   :  { %v779_v37 = vadd.f32 %v1444_v34, %v714_v36 }
 0x226   :  { %v710_v39 = vpop.xlane.xlu0 %709 }
 0x227   :  { %v914_v40 = vadd.f32 %v850_v23, %v779_v37  ;;  %v777_v41 = vadd.f32 %v1444_v34, %v710_v39 }
 0x228   :  { %v716_v43 = vpop.xlane.xlu1 %715 }
 0x229   :  { %947 = vst.msk [vmem:[%s1738_s7 + $0x10] sm:$0xff] %vm944_vm2, %v914_v40  ;;  %v912_v44 = vadd.f32 %v848_v38, %v777_v41  ;;  %v780_v45 = vadd.f32 %v1444_v34, %v716_v43  ;;  %v822_v38 = vld [vmem:[%s1737_s1 + $0x68] sm:$0xff]  ;;  %v860_v40 = vmul.f32 %v1441_v33, %v821_v35 }
 0x22a   :  { %v712_v47 = vpop.xlane.xlu0 %711 }
 0x22b   :  { %945 = vst.msk [vmem:[%s1738_s7] sm:$0xff] %vm944_vm2, %v912_v44  ;;  %v915_v49 = vadd.f32 %v851_v42, %v780_v45  ;;  %v778_v50 = vadd.f32 %v1444_v34, %v712_v47  ;;  %v827_v42 = vld [vmem:[%s1737_s1 + $0x90] sm:$0xff]  ;;  %v861_v45 = vmul.f32 %v1441_v33, %v822_v38  ;;  %v828_v47 = vld [vmem:[%s1737_s1 + $0x98] sm:$0xff] }
 0x22c   :  { %v867_v55 = vmul.f32 %v1441_v33, %v828_v47 }
 0x22d   :  { %948 = vst.msk [vmem:[%s1738_s7 + $0x18] sm:$0xff] %vm944_vm2, %v915_v49  ;;  %v913_v52 = vadd.f32 %v849_v46, %v778_v50  ;;  %v866_v50 = vmul.f32 %v1441_v33, %v827_v42 }
 0x22e   :  { %v722_v54 = vpop.xlane.xlu0 %721 }
 0x22f   :  { %946 = vst.msk [vmem:[%s1738_s7 + $0x8] sm:$0xff] %vm944_vm2, %v913_v52  ;;  %v783_v56 = vadd.f32 %v1444_v34, %v722_v54  ;;  %v825_v52 = vld [vmem:[%s1737_s1 + $0x80] sm:$0xff] }
 0x230   :  { %v724_v58 = vpop.xlane.xlu1 %723 }
 0x231   :  { %v918_v60 = vadd.f32 %v854_v53, %v783_v56  ;;  %v784_v61 = vadd.f32 %v1444_v34, %v724_v58 }
 0x232   :  { %v718_v63 = vpop.xlane.xlu0 %717 }
 0x233   :  { %951 = vst.msk [vmem:[%s1738_s7 + $0x30] sm:$0xff] %vm944_vm2, %v918_v60  ;;  %v919_v1 = vadd.f32 %v855_v57, %v784_v61  ;;  %v781_v2 = vadd.f32 %v1444_v34, %v718_v63  ;;  %v826_v57 = vld [vmem:[%s1737_s1 + $0x88] sm:$0xff]  ;;  %v864_v60 = vmul.f32 %v1441_v33, %v825_v52 }
 0x234   :  { %v720_v4 = vpop.xlane.xlu1 %719 }
 0x235   :  { %952 = vst.msk [vmem:[%s1738_s7 + $0x38] sm:$0xff] %vm944_vm2, %v919_v1  ;;  %v916_v6 = vadd.f32 %v852_v62, %v781_v2  ;;  %v782_v7 = vadd.f32 %v1444_v34, %v720_v4  ;;  %v831_v62 = vld [vmem:[%s1737_s1 + $0xb0] sm:$0xff]  ;;  %v865_v1 = vmul.f32 %v1441_v33, %v826_v57 }
 0x236   :  { %v730_v9 = vpop.xlane.xlu0 %729 }
 0x237   :  { %949 = vst.msk [vmem:[%s1738_s7 + $0x20] sm:$0xff] %vm944_vm2, %v916_v6  ;;  %v917_v11 = vadd.f32 %v853_v3, %v782_v7  ;;  %v787_v12 = vadd.f32 %v1444_v34, %v730_v9  ;;  %v832_v3 = vld [vmem:[%s1737_s1 + $0xb8] sm:$0xff]  ;;  %v870_v6 = vmul.f32 %v1441_v33, %v831_v62 }
 0x238   :  { %v732_v14 = vpop.xlane.xlu1 %731 }
 0x239   :  { %950 = vst.msk [vmem:[%s1738_s7 + $0x28] sm:$0xff] %vm944_vm2, %v917_v11  ;;  %v922_v16 = vadd.f32 %v858_v8, %v787_v12  ;;  %v788_v17 = vadd.f32 %v1444_v34, %v732_v14  ;;  %v829_v8 = vld [vmem:[%s1737_s1 + $0xa0] sm:$0xff]  ;;  %v871_v11 = vmul.f32 %v1441_v33, %v832_v3 }
 0x23a   :  { %v726_v19 = vpop.xlane.xlu0 %725 }
 0x23b   :  { %955 = vst.msk [vmem:[%s1738_s7 + $0x50] sm:$0xff] %vm944_vm2, %v922_v16  ;;  %v923_v31 = vadd.f32 %v859_v13, %v788_v17  ;;  %v785_v22 = vadd.f32 %v1444_v34, %v726_v19  ;;  %v830_v13 = vld [vmem:[%s1737_s1 + $0xa8] sm:$0xff]  ;;  %v868_v16 = vmul.f32 %v1441_v33, %v829_v8 }
 0x23c   :  { %v728_v25 = vpop.xlane.xlu1 %727 }
 0x23d   :  { %956 = vst.msk [vmem:[%s1738_s7 + $0x58] sm:$0xff] %vm944_vm2, %v923_v31  ;;  %v920_v28 = vadd.f32 %v856_v18, %v785_v22  ;;  %v786_v30 = vadd.f32 %v1444_v34, %v728_v25  ;;  %v835_v18 = vld [vmem:[%s1737_s1 + $0xd0] sm:$0xff]  ;;  %v869_v31 = vmul.f32 %v1441_v33, %v830_v13 }
 0x23e   :  { %v738_v20 = vpop.xlane.xlu0 %737 }
 0x23f   :  { %953 = vst.msk [vmem:[%s1738_s7 + $0x40] sm:$0xff] %vm944_vm2, %v920_v28  ;;  %v921_v23 = vadd.f32 %v857_v24, %v786_v30  ;;  %v791_v36 = vadd.f32 %v1444_v34, %v738_v20  ;;  %v836_v24 = vld [vmem:[%s1737_s1 + $0xd8] sm:$0xff]  ;;  %v874_v28 = vmul.f32 %v1441_v33, %v835_v18 }
 0x240   :  { %v740_v37 = vpop.xlane.xlu1 %739 }
 0x241   :  { %954 = vst.msk [vmem:[%s1738_s7 + $0x48] sm:$0xff] %vm944_vm2, %v921_v23  ;;  %v926_v39 = vadd.f32 %v862_v32, %v791_v36  ;;  %v792_v29 = vadd.f32 %v1444_v34, %v740_v37  ;;  %v833_v32 = vld [vmem:[%s1737_s1 + $0xc0] sm:$0xff]  ;;  %v875_v23 = vmul.f32 %v1441_v33, %v836_v24 }
 0x242   :  { %v734_v41 = vpop.xlane.xlu0 %733 }
 0x243   :  { %959 = vst.msk [vmem:[%s1738_s7 + $0x70] sm:$0xff] %vm944_vm2, %v926_v39  ;;  %v927_v43 = vadd.f32 %v863_v27, %v792_v29  ;;  %v789_v44 = vadd.f32 %v1444_v34, %v734_v41  ;;  %v834_v27 = vld [vmem:[%s1737_s1 + $0xc8] sm:$0xff]  ;;  %v872_v39 = vmul.f32 %v1441_v33, %v833_v32 }
 0x244   :  { %v736_v46 = vpop.xlane.xlu1 %735 }
 0x245   :  { %960 = vst.msk [vmem:[%s1738_s7 + $0x78] sm:$0xff] %vm944_vm2, %v927_v43  ;;  %v924_v48 = vadd.f32 %v860_v40, %v789_v44  ;;  %v790_v49 = vadd.f32 %v1444_v34, %v736_v46  ;;  %v837_v40 = vld [vmem:[%s1737_s1 + $0xe0] sm:$0xff]  ;;  %v873_v43 = vmul.f32 %v1441_v33, %v834_v27 }
 0x246   :  { %v746_v51 = vpop.xlane.xlu0 %745  ;;  %v876_v47 = vmul.f32 %v1441_v33, %v837_v40 }
 0x247   :  { %957 = vst.msk [vmem:[%s1738_s7 + $0x60] sm:$0xff] %vm944_vm2, %v924_v48  ;;  %v925_v53 = vadd.f32 %v861_v45, %v790_v49  ;;  %v795_v54 = vadd.f32 %v1444_v34, %v746_v51  ;;  %v838_v49 = vld [vmem:[%s1737_s1 + $0xe8] sm:$0xff] }
 0x248   :  { %v748_v56 = vpop.xlane.xlu1 %747 }
 0x249   :  { %958 = vst.msk [vmem:[%s1738_s7 + $0x68] sm:$0xff] %vm944_vm2, %v925_v53  ;;  %v930_v58 = vadd.f32 %v866_v50, %v795_v54  ;;  %v796_v59 = vadd.f32 %v1444_v34, %v748_v56  ;;  %v839_v50 = vld [vmem:[%s1737_s1 + $0xf0] sm:$0xff]  ;;  %v877_v54 = vmul.f32 %v1441_v33, %v838_v49 }
 0x24a   :  { %v742_v61 = vpop.xlane.xlu0 %741 }
 0x24b   :  { %963 = vst.msk [vmem:[%s1738_s7 + $0x90] sm:$0xff] %vm944_vm2, %v930_v58  ;;  %v931_v63 = vadd.f32 %v867_v55, %v796_v59  ;;  %v793_v0 = vadd.f32 %v1444_v34, %v742_v61  ;;  %v878_v55 = vmul.f32 %v1441_v33, %v839_v50  ;;  %v840_v58 = vld [vmem:[%s1737_s1 + $0xf8] sm:$0xff] }
 0x24c   :  { %v744_v2 = vpop.xlane.xlu1 %743 }
 0x24d   :  { %964 = vst.msk [vmem:[%s1738_s7 + $0x98] sm:$0xff] %vm944_vm2, %v931_v63  ;;  %v928_v4 = vadd.f32 %v864_v60, %v793_v0  ;;  %v794_v5 = vadd.f32 %v1444_v34, %v744_v2  ;;  %v879_v63 = vmul.f32 %v1441_v33, %v840_v58 }
 0x24e   :  { %v754_v7 = vpop.xlane.xlu0 %753 }
 0x24f   :  { %961 = vst.msk [vmem:[%s1738_s7 + $0x80] sm:$0xff] %vm944_vm2, %v928_v4  ;;  %v929_v9 = vadd.f32 %v865_v1, %v794_v5  ;;  %v799_v10 = vadd.f32 %v1444_v34, %v754_v7 }
 0x250   :  { %v756_v12 = vpop.xlane.xlu1 %755 }
 0x251   :  { %962 = vst.msk [vmem:[%s1738_s7 + $0x88] sm:$0xff] %vm944_vm2, %v929_v9  ;;  %v934_v14 = vadd.f32 %v870_v6, %v799_v10  ;;  %v800_v15 = vadd.f32 %v1444_v34, %v756_v12 }
 0x252   :  { %v750_v17 = vpop.xlane.xlu0 %749 }
 0x253   :  { %967 = vst.msk [vmem:[%s1738_s7 + $0xb0] sm:$0xff] %vm944_vm2, %v934_v14  ;;  %v935_v19 = vadd.f32 %v871_v11, %v800_v15  ;;  %v797_v21 = vadd.f32 %v1444_v34, %v750_v17 }
 0x254   :  { %v752_v22 = vpop.xlane.xlu1 %751 }
 0x255   :  { %968 = vst.msk [vmem:[%s1738_s7 + $0xb8] sm:$0xff] %vm944_vm2, %v935_v19  ;;  %v932_v25 = vadd.f32 %v868_v16, %v797_v21  ;;  %v798_v26 = vadd.f32 %v1444_v34, %v752_v22 }
 0x256   :  { %v762_v30 = vpop.xlane.xlu0 %761 }
 0x257   :  { %965 = vst.msk [vmem:[%s1738_s7 + $0xa0] sm:$0xff] %vm944_vm2, %v932_v25  ;;  %v933_v20 = vadd.f32 %v869_v31, %v798_v26  ;;  %v803_v35 = vadd.f32 %v1444_v34, %v762_v30 }
 0x258   :  { %v764_v36 = vpop.xlane.xlu1 %763 }
 0x259   :  { %966 = vst.msk [vmem:[%s1738_s7 + $0xa8] sm:$0xff] %vm944_vm2, %v933_v20  ;;  %v938_v37 = vadd.f32 %v874_v28, %v803_v35  ;;  %v804_v38 = vadd.f32 %v1444_v34, %v764_v36 }
 0x25a   :  { %v758_v29 = vpop.xlane.xlu0 %757 }
 0x25b   :  { %971 = vst.msk [vmem:[%s1738_s7 + $0xd0] sm:$0xff] %vm944_vm2, %v938_v37  ;;  %v939_v41 = vadd.f32 %v875_v23, %v804_v38  ;;  %v801_v42 = vadd.f32 %v1444_v34, %v758_v29 }
 0x25c   :  { %v760_v44 = vpop.xlane.xlu1 %759 }
 0x25d   :  { %972 = vst.msk [vmem:[%s1738_s7 + $0xd8] sm:$0xff] %vm944_vm2, %v939_v41  ;;  %v936_v45 = vadd.f32 %v872_v39, %v801_v42  ;;  %v802_v46 = vadd.f32 %v1444_v34, %v760_v44 }
 0x25e   :  { %v766_v48 = vpop.xlane.xlu0 %765 }
 0x25f   :  { %969 = vst.msk [vmem:[%s1738_s7 + $0xc0] sm:$0xff] %vm944_vm2, %v936_v45  ;;  %v937_v51 = vadd.f32 %v873_v43, %v802_v46  ;;  %v805_v52 = vadd.f32 %v1444_v34, %v766_v48 }
 0x261   :  { %970 = vst.msk [vmem:[%s1738_s7 + $0xc8] sm:$0xff] %vm944_vm2, %v937_v51  ;;  %v940_v53 = vadd.f32 %v876_v47, %v805_v52 }
 0x262   :  { %v768_v56 = vpop.xlane.xlu1 %767  ;;  %v770_v57 = vpop.xlane.xlu0 %769 }
 0x263   :  { %973 = vst.msk [vmem:[%s1738_s7 + $0xe0] sm:$0xff] %vm944_vm2, %v940_v53  ;;  %v806_v59 = vadd.f32 %v1444_v34, %v768_v56  ;;  %v807_v60 = vadd.f32 %v1444_v34, %v770_v57 }
 0x265   :  { %v941_v61 = vadd.f32 %v877_v54, %v806_v59  ;;  %v942_v62 = vadd.f32 %v878_v55, %v807_v60 }
 0x266   :  { %v772_v0 = vpop.xlane.xlu1 %771 }
 0x267   :  { %974 = vst.msk [vmem:[%s1738_s7 + $0xe8] sm:$0xff] %vm944_vm2, %v941_v61  ;;  %975 = vst.msk [vmem:[%s1738_s7 + $0xf0] sm:$0xff] %vm944_vm2, %v942_v62  ;;  %v808_v1 = vadd.f32 %v1444_v34, %v772_v0 }
 0x269   :  { %v943_v2 = vadd.f32 %v879_v63, %v808_v1 }
 0x26b   :  { %976 = vst.msk [vmem:[%s1738_s7 + $0xf8] sm:$0xff] %vm944_vm2, %v943_v2 }

</bundles_post_ra>
